<compile_context>
chip_gen: v7x
topology: tpu7x:2x2x1
jax: 0.10.0
libtpu: 0.0.40
codegen_flags: <defaults>
</compile_context>

<pallas_src>
import functools

import jax
import jax.numpy as jnp
from jax.experimental import pallas as pl
from jax.experimental.pallas import tpu as pltpu


_LANE = 128


def _round_up(x, m):
    return ((x + m - 1) // m) * m


def _pad2(x, rows, cols, dtype):
    """Zero-pad a 2-D array to [rows, cols] and cast (init-time only)."""
    r, c = x.shape
    return jnp.pad(x.astype(dtype), ((0, rows - r), (0, cols - c)))


def _fused_gcn_kernel(a_ref, x_ref, w1_ref, b1_ref, w2_ref, b2_ref,
                      w3_ref, b3_ref, o_ref, *, fout):
    """out = log_softmax(A @ relu(A @ relu((A@X)@W1+b1) @ W2+b2) @ W3 + b3)."""
    # A and X arrive f32 (no wrapper-side cast ops); bf16 is an MXU-input
    # format only — accumulation and all elementwise math stay f32.
    a = a_ref[...].astype(jnp.bfloat16)              # [Np, Np]
    x = x_ref[...].astype(jnp.bfloat16)              # [Np, Fin_p]

    # ---- Layer 1: propagate -> linear -> relu -------------------------------
    agg = jnp.dot(a, x, preferred_element_type=jnp.float32)
    z = jnp.dot(agg.astype(jnp.bfloat16), w1_ref[...],
                preferred_element_type=jnp.float32) + b1_ref[...]
    h = jnp.maximum(z, 0.0)
    # (dropout: identity in eval mode)

    # ---- Layer 2: propagate -> linear -> relu -------------------------------
    agg = jnp.dot(a, h.astype(jnp.bfloat16), preferred_element_type=jnp.float32)
    z = jnp.dot(agg.astype(jnp.bfloat16), w2_ref[...],
                preferred_element_type=jnp.float32) + b2_ref[...]
    h = jnp.maximum(z, 0.0)
    # (dropout: identity in eval mode)

    # ---- Layer 3: propagate -> linear (natural module order; after lane
    # padding fout_p == hid_p so reordering A@(H@W3) saves nothing) -----------
    agg = jnp.dot(a, h.astype(jnp.bfloat16), preferred_element_type=jnp.float32)
    z = jnp.dot(agg.astype(jnp.bfloat16), w3_ref[...],
                preferred_element_type=jnp.float32) + b3_ref[...]

    # log_softmax over the (lane-padded) feature axis; padded lanes masked out.
    lane = jax.lax.broadcasted_iota(jnp.int32, z.shape, 1)
    valid = lane < fout
    zm = jnp.where(valid, z, -jnp.inf)
    m = jnp.max(zm, axis=1, keepdims=True)
    s = zm - m
    lse = jnp.log(jnp.sum(jnp.exp(s), axis=1, keepdims=True))
    out = s - lse
    o_ref[...] = jnp.where(valid, out, 0.0).astype(o_ref.dtype)


def prepare_params(params):
    """Pad + cast the (w, b) triples ONCE at init time (out of the hot path).

    Returns a flat tuple (w1,b1,w2,b2,w3,b3) of lane-padded arrays plus the
    unpadded fout (needed for the in-kernel log_softmax mask).
    """
    (w1, b1), (w2, b2), (w3, b3) = params
    fin, hid = w1.shape
    fout = w3.shape[1]
    fin_p = _round_up(fin, _LANE)
    hid_p = _round_up(hid, _LANE)
    fout_p = _round_up(fout, _LANE)
    packed = (
        _pad2(w1, fin_p, hid_p, jnp.bfloat16),
        _pad2(b1, 1, hid_p, jnp.float32),
        _pad2(w2, hid_p, hid_p, jnp.bfloat16),
        _pad2(b2, 1, hid_p, jnp.float32),
        _pad2(w3, hid_p, fout_p, jnp.bfloat16),
        _pad2(b3, 1, fout_p, jnp.float32),
    )
    return packed, fout


@functools.partial(jax.jit, static_argnames=("fout",))
def gcn_forward(x, adj_p, packed_params, *, fout):
    """x: [N, Fin] f32, adj_p: [N_p, N_p] f32 (pre-padded, A[dst,src]=weight).

    Returns the [N, fout] log_softmax output (padding sliced off).
    """
    w1_p, b1_p, w2_p, b2_p, w3_p, b3_p = packed_params
    n, fin = x.shape
    n_p = adj_p.shape[0]
    fin_p = w1_p.shape[0]
    hid_p = w1_p.shape[1]
    fout_p = w3_p.shape[1]

    # Single pad op for x (f32; bf16 cast happens inside the kernel).
    if (n, fin) != (n_p, fin_p):
        x = jnp.pad(x, ((0, n_p - n), (0, fin_p - fin)))

    flops = 2 * (n_p * n_p * fin_p            # A @ X
                 + n_p * fin_p * hid_p        # @ W1
                 + n_p * n_p * hid_p          # A @ H1
                 + n_p * hid_p * hid_p        # @ W2
                 + n_p * n_p * hid_p          # A @ H2
                 + n_p * hid_p * fout_p)      # @ W3
    bytes_accessed = (adj_p.size * 4 + x.size * 4
                      + w1_p.size * 2 + w2_p.size * 2 + w3_p.size * 2
                      + (b1_p.size + b2_p.size + b3_p.size) * 4
                      + n_p * fout_p * 4)
    transcendentals = n_p * fout_p + n_p      # exp per element + log per row

    kernel = functools.partial(_fused_gcn_kernel, fout=fout)
    vmem_spec = pl.BlockSpec(memory_space=pltpu.MemorySpace.VMEM)

    out_p = pl.pallas_call(
        kernel,
        out_shape=jax.ShapeDtypeStruct((n_p, fout_p), jnp.float32),
        in_specs=[vmem_spec] * 8,
        out_specs=vmem_spec,
        cost_estimate=pl.CostEstimate(
            flops=flops,
            transcendentals=transcendentals,
            bytes_accessed=bytes_accessed,
        ),
    )(adj_p, x, w1_p, b1_p, w2_p, b2_p, w3_p, b3_p)

    # Un-pad for exact module semantics (drop this slice if the consumer can
    # handle the padded [N_p, fout_p] layout directly).
    return out_p[:n, :fout]


def init_linear_params(key, in_features, out_features):
    """Deterministic PyTorch-Linear-style init (uniform +/- 1/sqrt(fan_in))."""
    kw, kb = jax.random.split(key)
    bound = 1.0 / jnp.sqrt(jnp.float32(in_features))
    # Stored pre-transposed as [Fin, Fout] so the kernel does X @ W directly.
    w = jax.random.uniform(kw, (in_features, out_features), jnp.float32,
                           minval=-bound, maxval=bound)
    b = jax.random.uniform(kb, (1, out_features), jnp.float32,
                           minval=-bound, maxval=bound)
    return w, b


def build_dense_adjacency(edge_index, edge_weight, num_nodes):
    """A[dst, src] += edge_weight, built directly at the 128-padded size so no
    per-call padding op is needed (KPropagate scatter-add as a dense matrix)."""
    n_p = _round_up(num_nodes, _LANE)
    src = edge_index[0]
    dst = edge_index[1]
    adj = jnp.zeros((n_p, n_p), jnp.float32)
    adj = adj.at[dst, src].add(edge_weight)
    return adj


if __name__ == "__main__":
    key = jax.random.PRNGKey(0)

    # Small synthetic graph, consistent with the module's node-feature inputs.
    num_nodes = 64
    in_features = 16
    hidden_features = 32
    out_features = 8
    num_edges = 256

    k_x, k_src, k_dst, k_w, k_p1, k_p2, k_p3 = jax.random.split(key, 7)

    x = jax.random.normal(k_x, (num_nodes, in_features), jnp.float32)
    edge_index = jnp.stack(
        [
            jax.random.randint(k_src, (num_edges,), 0, num_nodes),
            jax.random.randint(k_dst, (num_edges,), 0, num_nodes),
        ],
        axis=0,
    )
    edge_weight = jax.random.uniform(k_w, (num_edges,), jnp.float32)

    adj_p = build_dense_adjacency(edge_index, edge_weight, num_nodes)

    params = (
        init_linear_params(k_p1, in_features, hidden_features),
        init_linear_params(k_p2, hidden_features, hidden_features),
        init_linear_params(k_p3, hidden_features, out_features),
    )
    packed_params, fout = prepare_params(params)   # one-time pad + bf16 cast

    out = gcn_forward(x, adj_p, packed_params, fout=fout)
    out = jax.block_until_ready(out)

    assert out.shape == (num_nodes, out_features)
    assert bool(jnp.all(jnp.isfinite(out)))
    # log_softmax rows should (approximately) sum to 1 in prob space.
    row_sums = jnp.sum(jnp.exp(out), axis=1)
    assert bool(jnp.all(jnp.abs(row_sums - 1.0) < 1e-2))
    print("KERNEL_OK")
</pallas_src>

<mosaic_0001>
module attributes {stable_mosaic.version = 11 : i64} {
  func.func @_fused_gcn_kernel(%arg0: memref<128x128xf32, #tpu.memory_space<vmem>>, %arg1: memref<128x128xf32, #tpu.memory_space<vmem>>, %arg2: memref<128x128xbf16, #tpu.memory_space<vmem>>, %arg3: memref<1x128xf32, #tpu.memory_space<vmem>>, %arg4: memref<128x128xbf16, #tpu.memory_space<vmem>>, %arg5: memref<1x128xf32, #tpu.memory_space<vmem>>, %arg6: memref<128x128xbf16, #tpu.memory_space<vmem>>, %arg7: memref<1x128xf32, #tpu.memory_space<vmem>>, %arg8: memref<128x128xf32, #tpu.memory_space<vmem>>) attributes {dimension_semantics = [], scalar_prefetch = 0 : i64, scratch_operands = 0 : i64, tpu.core_type = #tpu.core_type<tc>} {
    %c0 = arith.constant 0 : index
    %c0_0 = arith.constant 0 : index
    %0 = vector.load %arg0[%c0, %c0_0] : memref<128x128xf32, #tpu.memory_space<vmem>>, vector<128x128xf32>
    %1 = arith.truncf %0 : vector<128x128xf32> to vector<128x128xbf16>
    %c0_1 = arith.constant 0 : index
    %c0_2 = arith.constant 0 : index
    %2 = vector.load %arg1[%c0_1, %c0_2] : memref<128x128xf32, #tpu.memory_space<vmem>>, vector<128x128xf32>
    %3 = arith.truncf %2 : vector<128x128xf32> to vector<128x128xbf16>
    %cst = arith.constant dense<0.000000e+00> : vector<128x128xf32>
    %4 = tpu.matmul %1, %3, %cst {dimension_numbers = #tpu.dot_dimension_numbers<[1], [0], [0], [1], [0, 0, 1, 1], [], []>} : vector<128x128xbf16>, vector<128x128xbf16>, vector<128x128xf32> -> vector<128x128xf32>
    %5 = arith.truncf %4 : vector<128x128xf32> to vector<128x128xbf16>
    %c0_3 = arith.constant 0 : index
    %c0_4 = arith.constant 0 : index
    %6 = vector.load %arg2[%c0_3, %c0_4] : memref<128x128xbf16, #tpu.memory_space<vmem>>, vector<128x128xbf16>
    %cst_5 = arith.constant dense<0.000000e+00> : vector<128x128xf32>
    %7 = tpu.matmul %5, %6, %cst_5 {dimension_numbers = #tpu.dot_dimension_numbers<[1], [0], [0], [1], [0, 0, 1, 1], [], []>} : vector<128x128xbf16>, vector<128x128xbf16>, vector<128x128xf32> -> vector<128x128xf32>
    %c0_6 = arith.constant 0 : index
    %c0_7 = arith.constant 0 : index
    %8 = vector.load %arg3[%c0_6, %c0_7] : memref<1x128xf32, #tpu.memory_space<vmem>>, vector<1x128xf32>
    %9 = vector.broadcast %8 : vector<1x128xf32> to vector<128x128xf32>
    %10 = arith.addf %7, %9 : vector<128x128xf32>
    %cst_8 = arith.constant 0.000000e+00 : f32
    %11 = vector.broadcast %cst_8 : f32 to vector<128x128xf32>
    %12 = arith.maximumf %10, %11 : vector<128x128xf32>
    %13 = arith.truncf %12 : vector<128x128xf32> to vector<128x128xbf16>
    %cst_9 = arith.constant dense<0.000000e+00> : vector<128x128xf32>
    %14 = tpu.matmul %1, %13, %cst_9 {dimension_numbers = #tpu.dot_dimension_numbers<[1], [0], [0], [1], [0, 0, 1, 1], [], []>} : vector<128x128xbf16>, vector<128x128xbf16>, vector<128x128xf32> -> vector<128x128xf32>
    %15 = arith.truncf %14 : vector<128x128xf32> to vector<128x128xbf16>
    %c0_10 = arith.constant 0 : index
    %c0_11 = arith.constant 0 : index
    %16 = vector.load %arg4[%c0_10, %c0_11] : memref<128x128xbf16, #tpu.memory_space<vmem>>, vector<128x128xbf16>
    %cst_12 = arith.constant dense<0.000000e+00> : vector<128x128xf32>
    %17 = tpu.matmul %15, %16, %cst_12 {dimension_numbers = #tpu.dot_dimension_numbers<[1], [0], [0], [1], [0, 0, 1, 1], [], []>} : vector<128x128xbf16>, vector<128x128xbf16>, vector<128x128xf32> -> vector<128x128xf32>
    %c0_13 = arith.constant 0 : index
    %c0_14 = arith.constant 0 : index
    %18 = vector.load %arg5[%c0_13, %c0_14] : memref<1x128xf32, #tpu.memory_space<vmem>>, vector<1x128xf32>
    %19 = vector.broadcast %18 : vector<1x128xf32> to vector<128x128xf32>
    %20 = arith.addf %17, %19 : vector<128x128xf32>
    %cst_15 = arith.constant 0.000000e+00 : f32
    %21 = vector.broadcast %cst_15 : f32 to vector<128x128xf32>
    %22 = arith.maximumf %20, %21 : vector<128x128xf32>
    %23 = arith.truncf %22 : vector<128x128xf32> to vector<128x128xbf16>
    %cst_16 = arith.constant dense<0.000000e+00> : vector<128x128xf32>
    %24 = tpu.matmul %1, %23, %cst_16 {dimension_numbers = #tpu.dot_dimension_numbers<[1], [0], [0], [1], [0, 0, 1, 1], [], []>} : vector<128x128xbf16>, vector<128x128xbf16>, vector<128x128xf32> -> vector<128x128xf32>
    %25 = arith.truncf %24 : vector<128x128xf32> to vector<128x128xbf16>
    %c0_17 = arith.constant 0 : index
    %c0_18 = arith.constant 0 : index
    %26 = vector.load %arg6[%c0_17, %c0_18] : memref<128x128xbf16, #tpu.memory_space<vmem>>, vector<128x128xbf16>
    %cst_19 = arith.constant dense<0.000000e+00> : vector<128x128xf32>
    %27 = tpu.matmul %25, %26, %cst_19 {dimension_numbers = #tpu.dot_dimension_numbers<[1], [0], [0], [1], [0, 0, 1, 1], [], []>} : vector<128x128xbf16>, vector<128x128xbf16>, vector<128x128xf32> -> vector<128x128xf32>
    %c0_20 = arith.constant 0 : index
    %c0_21 = arith.constant 0 : index
    %28 = vector.load %arg7[%c0_20, %c0_21] : memref<1x128xf32, #tpu.memory_space<vmem>>, vector<1x128xf32>
    %29 = vector.broadcast %28 : vector<1x128xf32> to vector<128x128xf32>
    %30 = arith.addf %27, %29 : vector<128x128xf32>
    %31 = tpu.iota {dimensions = array<i32: 1>} : vector<128x128xi32>
    %c8_i32 = arith.constant 8 : i32
    %32 = vector.broadcast %c8_i32 : i32 to vector<128x128xi32>
    %33 = arith.cmpi slt, %31, %32 : vector<128x128xi32>
    %cst_22 = arith.constant 0xFF800000 : f32
    %34 = vector.broadcast %cst_22 : f32 to vector<128x128xf32>
    %35 = arith.select %33, %30, %34 : vector<128x128xi1>, vector<128x128xf32>
    %cst_23 = arith.constant dense<0xFF800000> : vector<128xf32>
    %36 = vector.multi_reduction <maximumf>, %35, %cst_23 [1] : vector<128x128xf32> to vector<128xf32>
    %37 = vector.shape_cast %36 : vector<128xf32> to vector<128x1xf32>
    %38 = vector.broadcast %37 : vector<128x1xf32> to vector<128x128xf32>
    %39 = arith.subf %35, %38 : vector<128x128xf32>
    %40 = math.exp %39 : vector<128x128xf32>
    %cst_24 = arith.constant dense<0.000000e+00> : vector<128xf32>
    %41 = vector.multi_reduction <add>, %40, %cst_24 [1] : vector<128x128xf32> to vector<128xf32>
    %42 = vector.shape_cast %41 : vector<128xf32> to vector<128x1xf32>
    %43 = math.log %42 : vector<128x1xf32>
    %44 = vector.broadcast %43 : vector<128x1xf32> to vector<128x128xf32>
    %45 = arith.subf %39, %44 : vector<128x128xf32>
    %cst_25 = arith.constant 0.000000e+00 : f32
    %46 = vector.broadcast %cst_25 : f32 to vector<128x128xf32>
    %47 = arith.select %33, %45, %46 : vector<128x128xi1>, vector<128x128xf32>
    %c0_26 = arith.constant 0 : index
    %c0_27 = arith.constant 0 : index
    %48 = vector.load %arg8[%c0_26, %c0_27] : memref<128x128xf32, #tpu.memory_space<vmem>>, vector<128x128xf32>
    tpu.vector_store %arg8[%c0_26, %c0_27], %47 {strides = array<i32>} : memref<128x128xf32, #tpu.memory_space<vmem>>, vector<128x128xf32>,
    return
  }
}

</mosaic_0001>

<bundles_post_ra>
// kernel: gcn_forward.1
= control target key start
LH: loop header
LB: loop body
LE: loop exit
PB: predicated region body
PF: predicated region fallthrough
CT: control target
= control target key end

     0   :  { %13 = vsyncpa [#allocation3], 0  ;;  %s1605_s27 = smov [#allocation2]   ;;  %s2061_s0 = inlined_call_operand.vmem [shape: f32[128,128], index: 0, kind: input, shape index: {}]   ;;  %s2062_s1 = inlined_call_operand.vmem [shape: f32[128,128], index: 1, kind: input, shape index: {}]   ;;  %s2063_s2 = inlined_call_operand.vmem [shape: bf16[128,128], index: 2, kind: input, shape index: {}]   ;;  %s2064_s3 = inlined_call_operand.vmem [shape: f32[1,128], index: 3, kind: input, shape index: {}]   ;;  %s2065_s4 = inlined_call_operand.vmem [shape: bf16[128,128], index: 4, kind: input, shape index: {}]   ;;  %s2066_s5 = inlined_call_operand.vmem [shape: f32[1,128], index: 5, kind: input, shape index: {}]   ;;  %s2067_s6 = inlined_call_operand.hbm [shape: bf16[128,128], index: 6, kind: input, shape index: {}]   ;;  %s2068_s7 = inlined_call_operand.vmem [shape: f32[1,128], index: 7, kind: input, shape index: {}]   ;;  %s2069_s8 = inlined_call_operand.vmem [shape: f32[128,128], index: 8, kind: output, shape index: {}]  }
   0x1   :  { %s31_s28 = sshll.u32 %s1605_s27, 4  ;;  %s1581_s9 = scalar_lea.hbm %s2067_s6, 1024  ;;  %s32_s28 = int_to_ptr.vmem [resolvable:$true] %s31_s28 }
   0x2   :  { %p1582_p0 = scmp.ne.s32.totalorder %s2067_s6, %s1581_s9  ;;  %p1585_p1 = scmp.lt.u32.totalorder %s1581_s9, %s2067_s6 }
   0x4   :  { %p1587_p2 = pnand %p1585_p1, %p1582_p0 }
   0x6   :  { %1590 = shalt.err (!%p1587_p2)
}
   0x7   :  { %s1591_s14 = scalar_lea.vmem %s32_s28, 1024  ;;  %p1596_p4 = scmp.lt.s32.totalorder %s32_s28, %s32_s28 }
   0x8   :  { %p1592_p3 = scmp.ne.s32.totalorder %s32_s28, %s1591_s14  ;;  %p1597_p5 = scmp.lt.s32.totalorder %s1591_s14, %s1591_s14 }
   0xa   :  { %p1598_p6 = por %p1597_p5, %p1596_p4 }
   0xc   :  { %p1599_p7 = pnand %p1598_p6, %p1592_p3 }
   0xe   :  { %1602 = shalt.err (!%p1599_p7)
}
   0xf   :  { %s1606_s15 = smov 64   ;;  %s1607_s16 = smov 4  }
  0x10   :  { %37 = dma.hbm_to_vmem [thread:$0]  %s2067_s6, 1024, %s32_s28, [#allocation3], %s1606_s15, %s1606_s15, %s1607_s16  }
  0x11   :  { %1603 = dma.done.wait [#allocation3], 1024  }
  0x12   :  { %1604 = vsyncadd [#allocation3], 4294966272  ;;  %v68_v0 = vld [vmem:[%s2062_s1] sm:$0xff]  ;;  %v69_v1 = vld [vmem:[%s2062_s1 + $0x8] sm:$0xff] }
  0x13   :  { %v70_v2 = vld [vmem:[%s2062_s1 + $0x10] sm:$0xff]  ;;  %v84_v3 = vpack.c.bf16 %v69_v1, %v68_v0  ;;  %v71_v4 = vld [vmem:[%s2062_s1 + $0x18] sm:$0xff]  ;;  %v72_v6 = vld [vmem:[%s2062_s1 + $0x20] sm:$0xff] }
  0x14   :  { %v85_v5 = vpack.c.bf16 %v71_v4, %v70_v2  ;;  %v73_v7 = vld [vmem:[%s2062_s1 + $0x28] sm:$0xff]  ;;  %v44_v9 = vld [vmem:[%s2061_s0] sm:$0xff]  ;;  %v74_v11 = vld [vmem:[%s2062_s1 + $0x30] sm:$0xff] }
  0x15   :  { %1298 = vmatprep.subr.bf16.mxu0 %v84_v3  ;;  %v86_v8 = vpack.c.bf16 %v73_v7, %v72_v6  ;;  %v45_v10 = vld [vmem:[%s2061_s0 + $0x8] sm:$0xff]  ;;  %v75_v12 = vld [vmem:[%s2062_s1 + $0x38] sm:$0xff]  ;;  %v76_v15 = vld [vmem:[%s2062_s1 + $0x40] sm:$0xff] }
  0x16   :  { %1299 = vmatpush3.bf16.msra.mxu0 %v84_v3  ;;  %v1695_v13 = vpack.c.bf16 %v45_v10, %v44_v9  ;;  %v87_v14 = vpack.c.bf16 %v75_v12, %v74_v11  ;;  %v77_v16 = vld [vmem:[%s2062_s1 + $0x48] sm:$0xff]  ;;  %v1493_v17 = vld [vmem:[%s2063_s2] sm:$0xff]   ;;  %v78_v20 = vld [vmem:[%s2062_s1 + $0x50] sm:$0xff] }
  0x17   :  { %1300 = vmatprep.subr.bf16.mxu0 %v85_v5  ;;  %v1494_v18 = vld [vmem:[%s2063_s2 + $0x8] sm:$0xff]   ;;  %v88_v19 = vpack.c.bf16 %v77_v16, %v76_v15  ;;  %1330 = vmatprep.subr.bf16.mxu1 %v1493_v17  ;;  %v79_v21 = vld [vmem:[%s2062_s1 + $0x58] sm:$0xff]  ;;  %v1495_v22 = vld [vmem:[%s2063_s2 + $0x10] sm:$0xff]  }
  0x18   :  { %1314 = vmatprep.mubr.bf16.mxu0 %v1695_v13  ;;  %1331 = vmatpush3.bf16.msra.mxu1 %v1493_v17  ;;  %v80_v23 = vld [vmem:[%s2062_s1 + $0x60] sm:$0xff]  ;;  %v81_v24 = vld [vmem:[%s2062_s1 + $0x68] sm:$0xff]  ;;  %v89_v25 = vpack.c.bf16 %v79_v21, %v78_v20  ;;  %v1496_v26 = vld [vmem:[%s2063_s2 + $0x18] sm:$0xff]  }
  0x19   :  { %1332 = vmatprep.subr.bf16.mxu1 %v1494_v18  ;;  %v82_v27 = vld [vmem:[%s2062_s1 + $0x70] sm:$0xff]  ;;  %v83_v28 = vld [vmem:[%s2062_s1 + $0x78] sm:$0xff]  ;;  %v90_v29 = vpack.c.bf16 %v81_v24, %v80_v23  ;;  %v1497_v30 = vld [vmem:[%s2063_s2 + $0x20] sm:$0xff]  }
  0x1a   :  { %1301 = vmatpush3.bf16.msra.mxu0 %v85_v5  ;;  %v91_v31 = vpack.c.bf16 %v83_v28, %v82_v27  ;;  %v1498_v32 = vld [vmem:[%s2063_s2 + $0x28] sm:$0xff]   ;;  %v46_v33 = vld [vmem:[%s2061_s0 + $0x10] sm:$0xff]  ;;  %v47_v34 = vld [vmem:[%s2061_s0 + $0x18] sm:$0xff] }
  0x1b   :  { %1302 = vmatprep.subr.bf16.mxu0 %v86_v8  ;;  %v48_v35 = vld [vmem:[%s2061_s0 + $0x20] sm:$0xff]  ;;  %v49_v36 = vld [vmem:[%s2061_s0 + $0x28] sm:$0xff]  ;;  %v1752_v37 = vpack.c.bf16 %v47_v34, %v46_v33  ;;  %v1499_v38 = vld [vmem:[%s2063_s2 + $0x30] sm:$0xff]  }
  0x1c   :  { %1333 = vmatpush3.bf16.msra.mxu1 %v1494_v18  ;;  %v1757_v39 = vpack.c.bf16 %v49_v36, %v48_v35  ;;  %v50_v40 = vld [vmem:[%s2061_s0 + $0x30] sm:$0xff]  ;;  %v51_v41 = vld [vmem:[%s2061_s0 + $0x38] sm:$0xff]  ;;  %v52_v42 = vld [vmem:[%s2061_s0 + $0x40] sm:$0xff] }
  0x1d   :  { %1334 = vmatprep.subr.bf16.mxu1 %v1495_v22  ;;  %v53_v43 = vld [vmem:[%s2061_s0 + $0x48] sm:$0xff]  ;;  %v1773_v44 = vpack.c.bf16 %v51_v41, %v50_v40  ;;  %v54_v46 = vld [vmem:[%s2061_s0 + $0x50] sm:$0xff]  ;;  %v55_v47 = vld [vmem:[%s2061_s0 + $0x58] sm:$0xff] }
  0x1e   :  { %1303 = vmatpush3.bf16.msra.mxu0 %v86_v8  ;;  %v1775_v45 = vpack.c.bf16 %v53_v43, %v52_v42  ;;  %v56_v48 = vld [vmem:[%s2061_s0 + $0x60] sm:$0xff]  ;;  %v57_v49 = vld [vmem:[%s2061_s0 + $0x68] sm:$0xff]  ;;  %v1791_v50 = vpack.c.bf16 %v55_v47, %v54_v46  ;;  %v58_v52 = vld [vmem:[%s2061_s0 + $0x70] sm:$0xff] }
  0x1f   :  { %1304 = vmatprep.subr.bf16.mxu0 %v87_v14  ;;  %v1793_v51 = vpack.c.bf16 %v57_v49, %v56_v48  ;;  %v59_v53 = vld [vmem:[%s2061_s0 + $0x78] sm:$0xff]  ;;  %v1501_v17 = vld [vmem:[%s2065_s4] sm:$0xff]   ;;  %v1502_v18 = vld [vmem:[%s2065_s4 + $0x8] sm:$0xff]  }
  0x20   :  { %1335 = vmatpush3.bf16.msra.mxu1 %v1495_v22  ;;  %v1803_v54 = vpack.c.bf16 %v59_v53, %v58_v52  ;;  %v1500_v55 = vld [vmem:[%s2063_s2 + $0x38] sm:$0xff]   ;;  %v1505_v21 = vld [vmem:[%s2065_s4 + $0x20] sm:$0xff]   ;;  %v1506_v22 = vld [vmem:[%s2065_s4 + $0x28] sm:$0xff]  }
  0x21   :  { %1336 = vmatprep.subr.bf16.mxu1 %v1496_v26  ;;  %v1504_v20 = vld [vmem:[%s2065_s4 + $0x18] sm:$0xff]   ;;  %v1507_v23 = vld [vmem:[%s2065_s4 + $0x30] sm:$0xff]   ;;  %v1175_v24 = vld [vmem:[%s2064_s3] ss:$0 sm:$0xff] }
  0x22   :  { %1305 = vmatpush3.bf16.msra.mxu0 %v87_v14 }
  0x23   :  { %1306 = vmatprep.subr.bf16.mxu0 %v88_v19 }
  0x24   :  { %1337 = vmatpush3.bf16.msra.mxu1 %v1496_v26 }
  0x25   :  { %1338 = vmatprep.subr.bf16.mxu1 %v1497_v30 }
  0x26   :  { %1307 = vmatpush3.bf16.msra.mxu0 %v88_v19  ;;  %v1503_v19 = vld [vmem:[%s2065_s4 + $0x10] sm:$0xff]  }
  0x27   :  { %1308 = vmatprep.subr.bf16.mxu0 %v89_v25 }
  0x28   :  { %1339 = vmatpush3.bf16.msra.mxu1 %v1497_v30 }
  0x29   :  { %1340 = vmatprep.subr.bf16.mxu1 %v1498_v32 }
  0x2a   :  { %1309 = vmatpush3.bf16.msra.mxu0 %v89_v25 }
  0x2b   :  { %1310 = vmatprep.subr.bf16.mxu0 %v90_v29 }
  0x2c   :  { %1341 = vmatpush3.bf16.msra.mxu1 %v1498_v32 }
  0x2d   :  { %1342 = vmatprep.subr.bf16.mxu1 %v1499_v38 }
  0x2e   :  { %1311 = vmatpush3.bf16.msra.mxu0 %v90_v29 }
  0x2f   :  { %1312 = vmatprep.subr.bf16.mxu0 %v91_v31 }
  0x30   :  { %1343 = vmatpush3.bf16.msra.mxu1 %v1499_v38 }
  0x31   :  { %1344 = vmatprep.subr.bf16.mxu1 %v1500_v55 }
  0x32   :  { %1313 = vmatpush3.bf16.msra.mxu0 %v91_v31 }
  0x34   :  { %1345 = vmatpush3.bf16.msra.mxu1 %v1500_v55 }
  0x35   :  { %1315 = vmatmul.mubr.bf16.vlgmr.msra.gmra.mrb[0].mxu0 %v1752_v37  ;;  %1394 = vmatprep.subr.bf16.mxu1 %v1501_v17 }
  0x36   :  { %1318 = vmatprep.mubr.bf16.mxu0 %v1757_v39 }
  0x3d   :  { %1319 = vmatmul.mubr.bf16.gmra.mrb[4].mxu0 %v1773_v44 }
  0x3e   :  { %1322 = vmatprep.mubr.bf16.mxu0 %v1775_v45 }
  0x45   :  { %1323 = vmatmul.mubr.bf16.gmra.mrb[8].mxu0 %v1791_v50 }
  0x46   :  { %1326 = vmatprep.mubr.bf16.mxu0 %v1793_v51 }
  0x4d   :  { %1327 = vmatmul.mubr.bf16.gmra.mrb[12].mxu0 %v1803_v54 }
  0x4e   :  { %1378 = vmatprep.mubr.bf16.mxu0 %v1695_v13 }
 0x108   :  { %v1316_v56 = vpop.f32.mrb[0].mxu0 }
 0x109   :  { %v126_v57 = vpop.f32.mrb[1].mxu0 }
 0x10a   :  { %v1317_v58 = vpop.f32.mrb[2].mxu0 }
 0x10b   :  { %v190_v59 = vpack.c.bf16 %v1317_v58, %v1316_v56  ;;  %v129_v60 = vpop.f32.mrb[3].mxu0 }
 0x10c   :  { %v189_v61 = vpack.c.bf16 %v129_v60, %v126_v57 }
 0x10e   :  { %1346 = vmatprep.mubr.bf16.mxu1 %v189_v61 }
 0x10f   :  { %1347 = vmatmul.mubr.bf16.vlgmr.msra.gmra.mrb[0].mxu1 %v190_v59 }
 0x110   :  { %v1320_v62 = vpop.f32.mrb[4].mxu0  ;;  %1395 = vmatpush3.bf16.msra.mxu1 %v1501_v17 }
 0x111   :  { %v142_v63 = vpop.f32.mrb[5].mxu0  ;;  %1396 = vmatprep.subr.bf16.mxu1 %v1502_v18 }
 0x112   :  { %v1321_v0 = vpop.f32.mrb[6].mxu0 }
 0x113   :  { %v192_v1 = vpack.c.bf16 %v1321_v0, %v1320_v62  ;;  %v145_v2 = vpop.f32.mrb[7].mxu0 }
 0x114   :  { %v191_v3 = vpack.c.bf16 %v145_v2, %v142_v63  ;;  %1397 = vmatpush3.bf16.msra.mxu1 %v1502_v18 }
 0x115   :  { %1398 = vmatprep.subr.bf16.mxu1 %v1503_v19 }
 0x116   :  { %1350 = vmatprep.mubr.bf16.mxu1 %v191_v3 }
 0x117   :  { %1351 = vmatmul.mubr.bf16.gmra.mrb[4].mxu1 %v192_v1 }
 0x118   :  { %v1324_v4 = vpop.f32.mrb[8].mxu0  ;;  %1399 = vmatpush3.bf16.msra.mxu1 %v1503_v19 }
 0x119   :  { %v158_v5 = vpop.f32.mrb[9].mxu0  ;;  %1400 = vmatprep.subr.bf16.mxu1 %v1504_v20 }
 0x11a   :  { %v1325_v6 = vpop.f32.mrb[10].mxu0 }
 0x11b   :  { %v194_v7 = vpack.c.bf16 %v1325_v6, %v1324_v4  ;;  %v161_v8 = vpop.f32.mrb[11].mxu0 }
 0x11c   :  { %v193_v9 = vpack.c.bf16 %v161_v8, %v158_v5  ;;  %1401 = vmatpush3.bf16.msra.mxu1 %v1504_v20 }
 0x11d   :  { %1402 = vmatprep.subr.bf16.mxu1 %v1505_v21 }
 0x11e   :  { %1354 = vmatprep.mubr.bf16.mxu1 %v193_v9 }
 0x11f   :  { %1355 = vmatmul.mubr.bf16.gmra.mrb[8].mxu1 %v194_v7 }
 0x120   :  { %v1328_v10 = vpop.f32.mrb[12].mxu0  ;;  %1403 = vmatpush3.bf16.msra.mxu1 %v1505_v21 }
 0x121   :  { %v174_v11 = vpop.f32.mrb[13].mxu0  ;;  %1404 = vmatprep.subr.bf16.mxu1 %v1506_v22 }
 0x122   :  { %v1329_v12 = vpop.f32.mrb[14].mxu0 }
 0x123   :  { %v196_v14 = vpack.c.bf16 %v1329_v12, %v1328_v10  ;;  %v177_v15 = vpop.f32.mrb[15].mxu0 }
 0x124   :  { %v195_v16 = vpack.c.bf16 %v177_v15, %v174_v11  ;;  %1405 = vmatpush3.bf16.msra.mxu1 %v1506_v22 }
 0x125   :  { %1406 = vmatprep.subr.bf16.mxu1 %v1507_v23 }
 0x126   :  { %1358 = vmatprep.mubr.bf16.mxu1 %v195_v16 }
 0x127   :  { %1359 = vmatmul.mubr.bf16.gmra.mrb[12].mxu1 %v196_v14 }
 0x128   :  { %1407 = vmatpush3.bf16.msra.mxu1 %v1507_v23 }
 0x1e2   :  { %v1348_v25 = vpop.f32.mrb[0].mxu1 }
 0x1e3   :  { %v311_v26 = vadd.f32 %v1348_v25, %v1175_v24  ;;  %v302_v27 = vpop.f32.mrb[1].mxu1 }
 0x1e4   :  { %v303_v28 = vadd.f32 %v1175_v24, %v302_v27  ;;  %v1349_v29 = vpop.f32.mrb[2].mxu1 }
 0x1e5   :  { %v314_v30 = vadd.f32 %v1349_v29, %v1175_v24  ;;  %v305_v31 = vpop.f32.mrb[3].mxu1  ;;  %v367_v33 = vmax.f32 %v311_v26, 0.0 }
 0x1e6   :  { %v306_v32 = vadd.f32 %v1175_v24, %v305_v31  ;;  %v365_v35 = vmax.f32 %v303_v28, 0.0 }
 0x1e7   :  { %v368_v34 = vmax.f32 %v314_v30, 0.0 }
 0x1e8   :  { %v366_v36 = vmax.f32 %v306_v32, 0.0 }
 0x1e9   :  { %v382_v38 = vpack.c.bf16 %v368_v34, %v367_v33 }
 0x1ea   :  { %v381_v40 = vpack.c.bf16 %v366_v36, %v365_v35  ;;  %v1352_v41 = vpop.f32.mrb[4].mxu1 }
 0x1eb   :  { %v327_v42 = vadd.f32 %v1352_v41, %v1175_v24  ;;  %v318_v43 = vpop.f32.mrb[5].mxu1 }
 0x1ec   :  { %v319_v46 = vadd.f32 %v1175_v24, %v318_v43  ;;  %v1353_v47 = vpop.f32.mrb[6].mxu1  ;;  %1362 = vmatprep.subr.bf16.mxu0 %v381_v40 }
 0x1ed   :  { %v330_v48 = vadd.f32 %v1353_v47, %v1175_v24  ;;  %v321_v49 = vpop.f32.mrb[7].mxu1  ;;  %1363 = vmatpush3.bf16.msra.mxu0 %v381_v40  ;;  %v371_v53 = vmax.f32 %v327_v42, 0.0 }
 0x1ee   :  { %v322_v52 = vadd.f32 %v1175_v24, %v321_v49  ;;  %1364 = vmatprep.subr.bf16.mxu0 %v382_v38  ;;  %v369_v56 = vmax.f32 %v319_v46, 0.0 }
 0x1ef   :  { %v372_v55 = vmax.f32 %v330_v48, 0.0 }
 0x1f0   :  { %v370_v57 = vmax.f32 %v322_v52, 0.0 }
 0x1f1   :  { %v384_v58 = vpack.c.bf16 %v372_v55, %v371_v53  ;;  %1365 = vmatpush3.bf16.msra.mxu0 %v382_v38 }
 0x1f2   :  { %v383_v59 = vpack.c.bf16 %v370_v57, %v369_v56  ;;  %v1356_v60 = vpop.f32.mrb[8].mxu1  ;;  %v1509_v56 = vld [vmem:[#allocation2] sm:$0xff]   ;;  %v1510_v57 = vld [vmem:[#allocation2 + $0x8] sm:$0xff]  }
 0x1f3   :  { %v343_v61 = vadd.f32 %v1356_v60, %v1175_v24  ;;  %v334_v62 = vpop.f32.mrb[9].mxu1  ;;  %v1513_v60 = vld [vmem:[#allocation2 + $0x20] sm:$0xff]  }
 0x1f4   :  { %v335_v63 = vadd.f32 %v1175_v24, %v334_v62  ;;  %v1357_v0 = vpop.f32.mrb[10].mxu1  ;;  %1366 = vmatprep.subr.bf16.mxu0 %v383_v59  ;;  %v1515_v62 = vld [vmem:[#allocation2 + $0x30] sm:$0xff]  }
 0x1f5   :  { %v346_v1 = vadd.f32 %v1357_v0, %v1175_v24  ;;  %v337_v2 = vpop.f32.mrb[11].mxu1  ;;  %1367 = vmatpush3.bf16.msra.mxu0 %v383_v59  ;;  %v375_v4 = vmax.f32 %v343_v61, 0.0  ;;  %v1512_v59 = vld [vmem:[#allocation2 + $0x18] sm:$0xff]   ;;  %v1514_v61 = vld [vmem:[#allocation2 + $0x28] sm:$0xff]  }
 0x1f6   :  { %v338_v3 = vadd.f32 %v1175_v24, %v337_v2  ;;  %1368 = vmatprep.subr.bf16.mxu0 %v384_v58  ;;  %v373_v6 = vmax.f32 %v335_v63, 0.0  ;;  %v1184_v63 = vld [vmem:[%s2066_s5] ss:$0 sm:$0xff] }
 0x1f7   :  { %v376_v5 = vmax.f32 %v346_v1, 0.0 }
 0x1f8   :  { %v374_v7 = vmax.f32 %v338_v3, 0.0 }
 0x1f9   :  { %v386_v8 = vpack.c.bf16 %v376_v5, %v375_v4  ;;  %1369 = vmatpush3.bf16.msra.mxu0 %v384_v58  ;;  %v1511_v58 = vld [vmem:[#allocation2 + $0x10] sm:$0xff]  }
 0x1fa   :  { %v385_v9 = vpack.c.bf16 %v374_v7, %v373_v6  ;;  %v1360_v10 = vpop.f32.mrb[12].mxu1 }
 0x1fb   :  { %v359_v11 = vadd.f32 %v1360_v10, %v1175_v24  ;;  %v350_v12 = vpop.f32.mrb[13].mxu1 }
 0x1fc   :  { %v351_v14 = vadd.f32 %v1175_v24, %v350_v12  ;;  %v1361_v15 = vpop.f32.mrb[14].mxu1  ;;  %1370 = vmatprep.subr.bf16.mxu0 %v385_v9 }
 0x1fd   :  { %v362_v16 = vadd.f32 %v1361_v15, %v1175_v24  ;;  %v353_v17 = vpop.f32.mrb[15].mxu1  ;;  %1371 = vmatpush3.bf16.msra.mxu0 %v385_v9  ;;  %v379_v19 = vmax.f32 %v359_v11, 0.0 }
 0x1fe   :  { %v354_v18 = vadd.f32 %v1175_v24, %v353_v17  ;;  %1372 = vmatprep.subr.bf16.mxu0 %v386_v8  ;;  %v377_v21 = vmax.f32 %v351_v14, 0.0  ;;  %v1508_v24 = vld [vmem:[%s2065_s4 + $0x38] sm:$0xff]  }
 0x1ff   :  { %v380_v20 = vmax.f32 %v362_v16, 0.0  ;;  %1408 = vmatprep.subr.bf16.mxu1 %v1508_v24 }
 0x200   :  { %v378_v22 = vmax.f32 %v354_v18, 0.0  ;;  %1409 = vmatpush3.bf16.msra.mxu1 %v1508_v24 }
 0x201   :  { %v388_v23 = vpack.c.bf16 %v380_v20, %v379_v19  ;;  %1373 = vmatpush3.bf16.msra.mxu0 %v386_v8  ;;  %1458 = vmatprep.subr.bf16.mxu1 %v1509_v56 }
 0x202   :  { %v387_v25 = vpack.c.bf16 %v378_v22, %v377_v21 }
 0x204   :  { %1374 = vmatprep.subr.bf16.mxu0 %v387_v25 }
 0x205   :  { %1375 = vmatpush3.bf16.msra.mxu0 %v387_v25 }
 0x206   :  { %1376 = vmatprep.subr.bf16.mxu0 %v388_v23 }
 0x209   :  { %1377 = vmatpush3.bf16.msra.mxu0 %v388_v23 }
 0x20c   :  { %1379 = vmatmul.mubr.bf16.vlgmr.msra.gmra.mrb[16].mxu0 %v1752_v37 }
 0x20d   :  { %1382 = vmatprep.mubr.bf16.mxu0 %v1757_v39 }
 0x214   :  { %1383 = vmatmul.mubr.bf16.gmra.mrb[20].mxu0 %v1773_v44 }
 0x215   :  { %1386 = vmatprep.mubr.bf16.mxu0 %v1775_v45 }
 0x21c   :  { %1387 = vmatmul.mubr.bf16.gmra.mrb[24].mxu0 %v1791_v50 }
 0x21d   :  { %1390 = vmatprep.mubr.bf16.mxu0 %v1793_v51 }
 0x224   :  { %1391 = vmatmul.mubr.bf16.gmra.mrb[28].mxu0 %v1803_v54 }
 0x225   :  { %1442 = vmatprep.mubr.bf16.mxu0 %v1695_v13 }
 0x2df   :  { %v1380_v26 = vpop.f32.mrb[16].mxu0 }
 0x2e0   :  { %v423_v27 = vpop.f32.mrb[17].mxu0 }
 0x2e1   :  { %v1381_v28 = vpop.f32.mrb[18].mxu0 }
 0x2e2   :  { %v487_v29 = vpack.c.bf16 %v1381_v28, %v1380_v26  ;;  %v426_v30 = vpop.f32.mrb[19].mxu0 }
 0x2e3   :  { %v486_v31 = vpack.c.bf16 %v426_v30, %v423_v27 }
 0x2e5   :  { %1410 = vmatprep.mubr.bf16.mxu1 %v486_v31 }
 0x2e6   :  { %1411 = vmatmul.mubr.bf16.vlgmr.msra.gmra.mrb[16].mxu1 %v487_v29 }
 0x2e7   :  { %v1384_v32 = vpop.f32.mrb[20].mxu0  ;;  %1459 = vmatpush3.bf16.msra.mxu1 %v1509_v56 }
 0x2e8   :  { %v439_v33 = vpop.f32.mrb[21].mxu0  ;;  %1460 = vmatprep.subr.bf16.mxu1 %v1510_v57 }
 0x2e9   :  { %v1385_v34 = vpop.f32.mrb[22].mxu0 }
 0x2ea   :  { %v489_v35 = vpack.c.bf16 %v1385_v34, %v1384_v32  ;;  %v442_v36 = vpop.f32.mrb[23].mxu0 }
 0x2eb   :  { %v488_v13 = vpack.c.bf16 %v442_v36, %v439_v33  ;;  %1461 = vmatpush3.bf16.msra.mxu1 %v1510_v57 }
 0x2ec   :  { %1462 = vmatprep.subr.bf16.mxu1 %v1511_v58 }
 0x2ed   :  { %1414 = vmatprep.mubr.bf16.mxu1 %v488_v13 }
 0x2ee   :  { %1415 = vmatmul.mubr.bf16.gmra.mrb[20].mxu1 %v489_v35 }
 0x2ef   :  { %v1388_v38 = vpop.f32.mrb[24].mxu0  ;;  %1463 = vmatpush3.bf16.msra.mxu1 %v1511_v58 }
 0x2f0   :  { %v455_v40 = vpop.f32.mrb[25].mxu0  ;;  %1464 = vmatprep.subr.bf16.mxu1 %v1512_v59 }
 0x2f1   :  { %v1389_v41 = vpop.f32.mrb[26].mxu0 }
 0x2f2   :  { %v491_v42 = vpack.c.bf16 %v1389_v41, %v1388_v38  ;;  %v458_v43 = vpop.f32.mrb[27].mxu0 }
 0x2f3   :  { %v490_v46 = vpack.c.bf16 %v458_v43, %v455_v40  ;;  %1465 = vmatpush3.bf16.msra.mxu1 %v1512_v59 }
 0x2f4   :  { %1466 = vmatprep.subr.bf16.mxu1 %v1513_v60 }
 0x2f5   :  { %1418 = vmatprep.mubr.bf16.mxu1 %v490_v46 }
 0x2f6   :  { %1419 = vmatmul.mubr.bf16.gmra.mrb[24].mxu1 %v491_v42 }
 0x2f7   :  { %v1392_v47 = vpop.f32.mrb[28].mxu0  ;;  %1467 = vmatpush3.bf16.msra.mxu1 %v1513_v60 }
 0x2f8   :  { %v471_v48 = vpop.f32.mrb[29].mxu0  ;;  %1468 = vmatprep.subr.bf16.mxu1 %v1514_v61 }
 0x2f9   :  { %v1393_v49 = vpop.f32.mrb[30].mxu0 }
 0x2fa   :  { %v493_v52 = vpack.c.bf16 %v1393_v49, %v1392_v47  ;;  %v474_v53 = vpop.f32.mrb[31].mxu0 }
 0x2fb   :  { %v492_v55 = vpack.c.bf16 %v474_v53, %v471_v48  ;;  %1469 = vmatpush3.bf16.msra.mxu1 %v1514_v61 }
 0x2fc   :  { %1470 = vmatprep.subr.bf16.mxu1 %v1515_v62 }
 0x2fd   :  { %1422 = vmatprep.mubr.bf16.mxu1 %v492_v55 }
 0x2fe   :  { %1423 = vmatmul.mubr.bf16.gmra.mrb[28].mxu1 %v493_v52 }
 0x2ff   :  { %1471 = vmatpush3.bf16.msra.mxu1 %v1515_v62 }
 0x3b9   :  { %v1412_v0 = vpop.f32.mrb[16].mxu1 }
 0x3ba   :  { %v608_v1 = vadd.f32 %v1412_v0, %v1184_v63  ;;  %v599_v2 = vpop.f32.mrb[17].mxu1 }
 0x3bb   :  { %v600_v3 = vadd.f32 %v1184_v63, %v599_v2  ;;  %v1413_v4 = vpop.f32.mrb[18].mxu1 }
 0x3bc   :  { %v611_v5 = vadd.f32 %v1413_v4, %v1184_v63  ;;  %v602_v6 = vpop.f32.mrb[19].mxu1  ;;  %v664_v8 = vmax.f32 %v608_v1, 0.0 }
 0x3bd   :  { %v603_v7 = vadd.f32 %v1184_v63, %v602_v6  ;;  %v662_v10 = vmax.f32 %v600_v3, 0.0 }
 0x3be   :  { %v665_v9 = vmax.f32 %v611_v5, 0.0 }
 0x3bf   :  { %v663_v11 = vmax.f32 %v603_v7, 0.0 }
 0x3c0   :  { %v679_v12 = vpack.c.bf16 %v665_v9, %v664_v8 }
 0x3c1   :  { %v678_v14 = vpack.c.bf16 %v663_v11, %v662_v10  ;;  %v1416_v15 = vpop.f32.mrb[20].mxu1 }
 0x3c2   :  { %v624_v16 = vadd.f32 %v1416_v15, %v1184_v63  ;;  %v615_v17 = vpop.f32.mrb[21].mxu1 }
 0x3c3   :  { %v616_v18 = vadd.f32 %v1184_v63, %v615_v17  ;;  %v1417_v19 = vpop.f32.mrb[22].mxu1  ;;  %1426 = vmatprep.subr.bf16.mxu0 %v678_v14 }
 0x3c4   :  { %v627_v20 = vadd.f32 %v1417_v19, %v1184_v63  ;;  %v618_v21 = vpop.f32.mrb[23].mxu1  ;;  %1427 = vmatpush3.bf16.msra.mxu0 %v678_v14  ;;  %v668_v23 = vmax.f32 %v624_v16, 0.0 }
 0x3c5   :  { %v619_v22 = vadd.f32 %v1184_v63, %v618_v21  ;;  %1428 = vmatprep.subr.bf16.mxu0 %v679_v12  ;;  %v666_v24 = vmax.f32 %v616_v18, 0.0  ;;  %v959_v18 = vlaneseq }
 0x3c6   :  { %v669_v25 = vmax.f32 %v627_v20, 0.0  ;;  %v1193_v20 = vld [vmem:[%s2068_s7] ss:$0 sm:$0xff] }
 0x3c7   :  { %v667_v26 = vmax.f32 %v619_v22, 0.0  ;;  %v1855_v19 = vand.u32 127, %v959_v18 }
 0x3c8   :  { %v681_v27 = vpack.c.bf16 %v669_v25, %v668_v23  ;;  %1429 = vmatpush3.bf16.msra.mxu0 %v679_v12 }
 0x3c9   :  { %v680_v28 = vpack.c.bf16 %v667_v26, %v666_v24  ;;  %v1420_v29 = vpop.f32.mrb[24].mxu1  ;;  %vm961_vm0 = vcmp.lt.s32.totalorder %v1855_v19, 8 }
 0x3ca   :  { %v640_v30 = vadd.f32 %v1420_v29, %v1184_v63  ;;  %v631_v31 = vpop.f32.mrb[25].mxu1 }
 0x3cb   :  { %v632_v32 = vadd.f32 %v1184_v63, %v631_v31  ;;  %v1421_v33 = vpop.f32.mrb[26].mxu1  ;;  %1430 = vmatprep.subr.bf16.mxu0 %v680_v28 }
 0x3cc   :  { %v643_v34 = vadd.f32 %v1421_v33, %v1184_v63  ;;  %v634_v35 = vpop.f32.mrb[27].mxu1  ;;  %1431 = vmatpush3.bf16.msra.mxu0 %v680_v28  ;;  %v672_v13 = vmax.f32 %v640_v30, 0.0 }
 0x3cd   :  { %v635_v36 = vadd.f32 %v1184_v63, %v634_v35  ;;  %1432 = vmatprep.subr.bf16.mxu0 %v681_v27  ;;  %v670_v40 = vmax.f32 %v632_v32, 0.0 }
 0x3ce   :  { %v673_v38 = vmax.f32 %v643_v34, 0.0 }
 0x3cf   :  { %v671_v41 = vmax.f32 %v635_v36, 0.0 }
 0x3d0   :  { %v683_v42 = vpack.c.bf16 %v673_v38, %v672_v13  ;;  %1433 = vmatpush3.bf16.msra.mxu0 %v681_v27 }
 0x3d1   :  { %v682_v43 = vpack.c.bf16 %v671_v41, %v670_v40  ;;  %v1424_v46 = vpop.f32.mrb[28].mxu1 }
 0x3d2   :  { %v656_v47 = vadd.f32 %v1424_v46, %v1184_v63  ;;  %v647_v48 = vpop.f32.mrb[29].mxu1 }
 0x3d3   :  { %v648_v49 = vadd.f32 %v1184_v63, %v647_v48  ;;  %v1425_v52 = vpop.f32.mrb[30].mxu1  ;;  %1434 = vmatprep.subr.bf16.mxu0 %v682_v43 }
 0x3d4   :  { %v659_v53 = vadd.f32 %v1425_v52, %v1184_v63  ;;  %v650_v55 = vpop.f32.mrb[31].mxu1  ;;  %1435 = vmatpush3.bf16.msra.mxu0 %v682_v43  ;;  %v676_v57 = vmax.f32 %v656_v47, 0.0 }
 0x3d5   :  { %v651_v56 = vadd.f32 %v1184_v63, %v650_v55  ;;  %1436 = vmatprep.subr.bf16.mxu0 %v683_v42  ;;  %v674_v59 = vmax.f32 %v648_v49, 0.0  ;;  %v1516_v63 = vld [vmem:[#allocation2 + $0x38] sm:$0xff]  }
 0x3d6   :  { %v677_v58 = vmax.f32 %v659_v53, 0.0  ;;  %1472 = vmatprep.subr.bf16.mxu1 %v1516_v63 }
 0x3d7   :  { %v675_v60 = vmax.f32 %v651_v56, 0.0  ;;  %1473 = vmatpush3.bf16.msra.mxu1 %v1516_v63 }
 0x3d8   :  { %v685_v61 = vpack.c.bf16 %v677_v58, %v676_v57  ;;  %1437 = vmatpush3.bf16.msra.mxu0 %v683_v42 }
 0x3d9   :  { %v684_v62 = vpack.c.bf16 %v675_v60, %v674_v59 }
 0x3db   :  { %1438 = vmatprep.subr.bf16.mxu0 %v684_v62 }
 0x3dc   :  { %1439 = vmatpush3.bf16.msra.mxu0 %v684_v62 }
 0x3dd   :  { %1440 = vmatprep.subr.bf16.mxu0 %v685_v61 }
 0x3e0   :  { %1441 = vmatpush3.bf16.msra.mxu0 %v685_v61 }
 0x3e3   :  { %1443 = vmatmul.mubr.bf16.vlgmr.msra.gmra.mrb[32].mxu0 %v1752_v37 }
 0x3e4   :  { %1446 = vmatprep.mubr.bf16.mxu0 %v1757_v39 }
 0x3eb   :  { %1447 = vmatmul.mubr.bf16.gmra.mrb[36].mxu0 %v1773_v44 }
 0x3ec   :  { %1450 = vmatprep.mubr.bf16.mxu0 %v1775_v45 }
 0x3f3   :  { %1451 = vmatmul.mubr.bf16.gmra.mrb[40].mxu0 %v1791_v50 }
 0x3f4   :  { %1454 = vmatprep.mubr.bf16.mxu0 %v1793_v51 }
 0x3fb   :  { %1455 = vmatmul.mubr.bf16.gmra.mrb[44].mxu0 %v1803_v54 }
 0x4b6   :  { %v1444_v0 = vpop.f32.mrb[32].mxu0 }
 0x4b7   :  { %v720_v1 = vpop.f32.mrb[33].mxu0 }
 0x4b8   :  { %v1445_v2 = vpop.f32.mrb[34].mxu0 }
 0x4b9   :  { %v784_v3 = vpack.c.bf16 %v1445_v2, %v1444_v0  ;;  %v723_v37 = vpop.f32.mrb[35].mxu0 }
 0x4ba   :  { %v783_v4 = vpack.c.bf16 %v723_v37, %v720_v1 }
 0x4bc   :  { %1474 = vmatprep.mubr.bf16.mxu1 %v783_v4 }
 0x4bd   :  { %1475 = vmatmul.mubr.bf16.vlgmr.msra.gmra.mrb[32].mxu1 %v784_v3 }
 0x4be   :  { %v1448_v39 = vpop.f32.mrb[36].mxu0 }
 0x4bf   :  { %v736_v44 = vpop.f32.mrb[37].mxu0 }
 0x4c0   :  { %v1449_v45 = vpop.f32.mrb[38].mxu0 }
 0x4c1   :  { %v786_v5 = vpack.c.bf16 %v1449_v45, %v1448_v39  ;;  %v739_v50 = vpop.f32.mrb[39].mxu0 }
 0x4c2   :  { %v785_v6 = vpack.c.bf16 %v739_v50, %v736_v44 }
 0x4c4   :  { %1478 = vmatprep.mubr.bf16.mxu1 %v785_v6 }
 0x4c5   :  { %1479 = vmatmul.mubr.bf16.gmra.mrb[36].mxu1 %v786_v5 }
 0x4c6   :  { %v1452_v51 = vpop.f32.mrb[40].mxu0 }
 0x4c7   :  { %v752_v54 = vpop.f32.mrb[41].mxu0 }
 0x4c8   :  { %v1453_v7 = vpop.f32.mrb[42].mxu0 }
 0x4c9   :  { %v788_v8 = vpack.c.bf16 %v1453_v7, %v1452_v51  ;;  %v755_v9 = vpop.f32.mrb[43].mxu0 }
 0x4ca   :  { %v787_v10 = vpack.c.bf16 %v755_v9, %v752_v54 }
 0x4cc   :  { %1482 = vmatprep.mubr.bf16.mxu1 %v787_v10 }
 0x4cd   :  { %1483 = vmatmul.mubr.bf16.gmra.mrb[40].mxu1 %v788_v8 }
 0x4ce   :  { %v1456_v11 = vpop.f32.mrb[44].mxu0 }
 0x4cf   :  { %v768_v12 = vpop.f32.mrb[45].mxu0 }
 0x4d0   :  { %v1457_v14 = vpop.f32.mrb[46].mxu0 }
 0x4d1   :  { %v790_v15 = vpack.c.bf16 %v1457_v14, %v1456_v11  ;;  %v771_v16 = vpop.f32.mrb[47].mxu0 }
 0x4d2   :  { %v789_v17 = vpack.c.bf16 %v771_v16, %v768_v12 }
 0x4d4   :  { %1486 = vmatprep.mubr.bf16.mxu1 %v789_v17 }
 0x4d5   :  { %1487 = vmatmul.mubr.bf16.gmra.mrb[44].mxu1 %v790_v15 }
 0x590   :  { %v1476_v21 = vpop.f32.mrb[32].mxu1 }
 0x591   :  { %v905_v22 = vadd.f32 %v1476_v21, %v1193_v20  ;;  %v896_v23 = vpop.f32.mrb[33].mxu1 }
 0x592   :  { %v897_v25 = vadd.f32 %v1193_v20, %v896_v23  ;;  %v1477_v24 = vpop.f32.mrb[34].mxu1 }
 0x593   :  { %v908_v26 = vadd.f32 %v1477_v24, %v1193_v20  ;;  %v899_v27 = vpop.f32.mrb[35].mxu1  ;;  %v964_v28 = vsel %vm961_vm0, %v905_v22, -inf }
 0x594   :  { %v900_v29 = vadd.f32 %v1193_v20, %v899_v27  ;;  %982 = vmax.xlane.f32.xlu1 %v964_v28  ;;  %v962_v30 = vsel %vm961_vm0, %v897_v25, -inf }
 0x595   :  { %978 = vmax.xlane.f32.xlu0 %v962_v30  ;;  %v965_v31 = vsel %vm961_vm0, %v908_v26, -inf }
 0x596   :  { %v963_v33 = vsel %vm961_vm0, %v900_v29, -inf }
 0x598   :  { %984 = vmax.xlane.f32.xlu1 %v965_v31  ;;  %v1480_v32 = vpop.f32.mrb[36].mxu1 }
 0x599   :  { %v921_v34 = vadd.f32 %v1480_v32, %v1193_v20  ;;  %980 = vmax.xlane.f32.xlu0 %v963_v33  ;;  %v912_v35 = vpop.f32.mrb[37].mxu1 }
 0x59a   :  { %v1481_v36 = vpop.f32.mrb[38].mxu1  ;;  %v913_v41 = vadd.f32 %v1193_v20, %v912_v35 }
 0x59b   :  { %v924_v13 = vadd.f32 %v1481_v36, %v1193_v20  ;;  %v915_v38 = vpop.f32.mrb[39].mxu1  ;;  %v968_v40 = vsel %vm961_vm0, %v921_v34, -inf }
 0x59c   :  { %v916_v42 = vadd.f32 %v1193_v20, %v915_v38  ;;  %v966_v47 = vsel %vm961_vm0, %v913_v41, -inf }
 0x59d   :  { %990 = vmax.xlane.f32.xlu0 %v968_v40  ;;  %v969_v43 = vsel %vm961_vm0, %v924_v13, -inf }
 0x59e   :  { %992 = vmax.xlane.f32.xlu1 %v969_v43  ;;  %v967_v52 = vsel %vm961_vm0, %v916_v42, -inf }
 0x5a0   :  { %v1484_v46 = vpop.f32.mrb[40].mxu1 }
 0x5a1   :  { %v937_v48 = vadd.f32 %v1484_v46, %v1193_v20  ;;  %986 = vmax.xlane.f32.xlu0 %v966_v47  ;;  %v928_v49 = vpop.f32.mrb[41].mxu1 }
 0x5a2   :  { %988 = vmax.xlane.f32.xlu1 %v967_v52  ;;  %v1485_v53 = vpop.f32.mrb[42].mxu1  ;;  %v929_v58 = vadd.f32 %v1193_v20, %v928_v49 }
 0x5a3   :  { %v940_v55 = vadd.f32 %v1485_v53, %v1193_v20  ;;  %v931_v56 = vpop.f32.mrb[43].mxu1  ;;  %v972_v57 = vsel %vm961_vm0, %v937_v48, -inf }
 0x5a4   :  { %v932_v59 = vadd.f32 %v1193_v20, %v931_v56  ;;  %v1883_v62 = vsel %vm961_vm0, %v929_v58, -inf }
 0x5a5   :  { %998 = vmax.xlane.f32.xlu0 %v972_v57  ;;  %v973_v60 = vsel %vm961_vm0, %v940_v55, -inf }
 0x5a6   :  { %1000 = vmax.xlane.f32.xlu1 %v973_v60  ;;  %v1888_v0 = vsel %vm961_vm0, %v932_v59, -inf }
 0x5a8   :  { %v1488_v61 = vpop.f32.mrb[44].mxu1 }
 0x5a9   :  { %994 = vmax.xlane.f32.xlu0 %v1883_v62  ;;  %v944_v63 = vpop.f32.mrb[45].mxu1  ;;  %v953_v37 = vadd.f32 %v1488_v61, %v1193_v20 }
 0x5aa   :  { %v945_v1 = vadd.f32 %v1193_v20, %v944_v63  ;;  %996 = vmax.xlane.f32.xlu1 %v1888_v0  ;;  %v1489_v2 = vpop.f32.mrb[46].mxu1 }
 0x5ab   :  { %v947_v3 = vpop.f32.mrb[47].mxu1  ;;  %v956_v44 = vadd.f32 %v1489_v2, %v1193_v20  ;;  %v1903_v5 = vsel %vm961_vm0, %v953_v37, -inf }
 0x5ac   :  { %v948_v4 = vadd.f32 %v1193_v20, %v947_v3  ;;  %v1893_v39 = vsel %vm961_vm0, %v945_v1, -inf }
 0x5ad   :  { %1002 = vmax.xlane.f32.xlu0 %v1893_v39  ;;  %v1908_v50 = vsel %vm961_vm0, %v956_v44, -inf }
 0x5ae   :  { %v1898_v45 = vsel %vm961_vm0, %v948_v4, -inf }
 0x5af   :  { %1004 = vmax.xlane.f32.xlu1 %v1898_v45 }
 0x5b1   :  { %1006 = vmax.xlane.f32.xlu0 %v1903_v5 }
 0x5b3   :  { %1008 = vmax.xlane.f32.xlu1 %v1908_v50 }
 0x621   :  { %v983_v6 = vpop.xlane.xlu1 %982 }
 0x622   :  { %v1911_v51 = vsub.f32 %v964_v28, %v983_v6  ;;  %v979_v54 = vpop.xlane.xlu0 %978 }
 0x623   :  { %v1913_v7 = vsub.f32 %v962_v30, %v979_v54 }
 0x624   :  { %v1030_v8 = vmul.f32 1.442695, %v1911_v51 }
 0x625   :  { %v1026_v9 = vmul.f32 1.442695, %v1913_v7  ;;  %v985_v10 = vpop.xlane.xlu1 %984 }
 0x626   :  { %1517 = vpow2.f32 %v1030_v8  ;;  %v1917_v11 = vsub.f32 %v965_v31, %v985_v10  ;;  %v981_v12 = vpop.xlane.xlu0 %980 }
 0x627   :  { %v1919_v14 = vsub.f32 %v963_v33, %v981_v12  ;;  %1519 = vpow2.f32 %v1026_v9 }
 0x628   :  { %v1032_v15 = vmul.f32 1.442695, %v1917_v11 }
 0x629   :  { %v1028_v16 = vmul.f32 1.442695, %v1919_v14 }
 0x62a   :  { %1521 = vpow2.f32 %v1032_v15  ;;  %v991_v17 = vpop.xlane.xlu0 %990 }
 0x62b   :  { %v1923_v18 = vsub.f32 %v968_v40, %v991_v17  ;;  %v993_v20 = vpop.xlane.xlu1 %992  ;;  %1523 = vpow2.f32 %v1028_v16 }
 0x62c   :  { %v1925_v21 = vsub.f32 %v969_v43, %v993_v20 }
 0x62d   :  { %v1038_v22 = vmul.f32 1.442695, %v1923_v18 }
 0x62e   :  { %v1040_v23 = vmul.f32 1.442695, %v1925_v21  ;;  %v987_v25 = vpop.xlane.xlu0 %986 }
 0x62f   :  { %1525 = vpow2.f32 %v1038_v22  ;;  %v1929_v24 = vsub.f32 %v966_v47, %v987_v25  ;;  %v989_v26 = vpop.xlane.xlu1 %988 }
 0x630   :  { %v1518_v27 = vpop.eup %1517  ;;  %v1931_v28 = vsub.f32 %v967_v52, %v989_v26  ;;  %1527 = vpow2.f32 %v1040_v23 }
 0x631   :  { %v1034_v29 = vmul.f32 1.442695, %v1929_v24  ;;  %1062 = vadd.xlane.f32.xlu0 %v1518_v27  ;;  %v1520_v32 = vpop.eup %1519 }
 0x632   :  { %v1036_v30 = vmul.f32 1.442695, %v1931_v28  ;;  %v999_v31 = vpop.xlane.xlu0 %998 }
 0x633   :  { %1529 = vpow2.f32 %v1034_v29  ;;  %v1935_v33 = vsub.f32 %v972_v57, %v999_v31  ;;  %v1001_v34 = vpop.xlane.xlu1 %1000 }
 0x634   :  { %v1522_v35 = vpop.eup %1521  ;;  %v1937_v36 = vsub.f32 %v973_v60, %v1001_v34  ;;  %1531 = vpow2.f32 %v1036_v30 }
 0x635   :  { %v1046_v13 = vmul.f32 1.442695, %v1935_v33  ;;  %1064 = vadd.xlane.f32.xlu1 %v1522_v35  ;;  %1058 = vadd.xlane.f32.xlu0 %v1520_v32  ;;  %v1524_v43 = vpop.eup %1523 }
 0x636   :  { %v1048_v38 = vmul.f32 1.442695, %v1937_v36  ;;  %v995_v40 = vpop.xlane.xlu0 %994 }
 0x637   :  { %1533 = vpow2.f32 %v1046_v13  ;;  %v1942_v41 = vsub.f32 %v1883_v62, %v995_v40  ;;  %v997_v42 = vpop.xlane.xlu1 %996 }
 0x638   :  { %v1945_v46 = vsub.f32 %v1888_v0, %v997_v42  ;;  %1535 = vpow2.f32 %v1048_v38 }
 0x639   :  { %v1526_v47 = vpop.eup %1525  ;;  %v1042_v48 = vmul.f32 1.442695, %v1942_v41  ;;  %1060 = vadd.xlane.f32.xlu1 %v1524_v43 }
 0x63a   :  { %v1044_v49 = vmul.f32 1.442695, %v1945_v46  ;;  %1070 = vadd.xlane.f32.xlu0 %v1526_v47  ;;  %v1003_v52 = vpop.xlane.xlu0 %1002  ;;  %v1528_v55 = vpop.eup %1527 }
 0x63b   :  { %1537 = vpow2.f32 %v1042_v48  ;;  %v1950_v53 = vsub.f32 %v1893_v39, %v1003_v52 }
 0x63c   :  { %v1005_v56 = vpop.xlane.xlu1 %1004  ;;  %1539 = vpow2.f32 %v1044_v49 }
 0x63d   :  { %v1530_v57 = vpop.eup %1529  ;;  %v1050_v58 = vmul.f32 1.442695, %v1950_v53  ;;  %v1954_v59 = vsub.f32 %v1898_v45, %v1005_v56  ;;  %1072 = vadd.xlane.f32.xlu1 %v1528_v55 }
 0x63e   :  { %1066 = vadd.xlane.f32.xlu0 %v1530_v57  ;;  %v1007_v60 = vpop.xlane.xlu0 %1006  ;;  %v1532_v63 = vpop.eup %1531 }
 0x63f   :  { %1541 = vpow2.f32 %v1050_v58  ;;  %v1052_v61 = vmul.f32 1.442695, %v1954_v59  ;;  %v1958_v62 = vsub.f32 %v1903_v5, %v1007_v60 }
 0x640   :  { %v1009_v0 = vpop.xlane.xlu1 %1008 }
 0x641   :  { %v1534_v1 = vpop.eup %1533  ;;  %1543 = vpow2.f32 %v1052_v61  ;;  %v1054_v2 = vmul.f32 1.442695, %v1958_v62  ;;  %v1962_v3 = vsub.f32 %v1908_v50, %v1009_v0  ;;  %1068 = vadd.xlane.f32.xlu1 %v1532_v63 }
 0x642   :  { %1078 = vadd.xlane.f32.xlu0 %v1534_v1  ;;  %v1536_v4 = vpop.eup %1535 }
 0x643   :  { %1545 = vpow2.f32 %v1054_v2  ;;  %v1056_v37 = vmul.f32 1.442695, %v1962_v3 }
 0x645   :  { %v1538_v39 = vpop.eup %1537  ;;  %1547 = vpow2.f32 %v1056_v37  ;;  %1080 = vadd.xlane.f32.xlu1 %v1536_v4 }
 0x646   :  { %1074 = vadd.xlane.f32.xlu0 %v1538_v39  ;;  %v1540_v44 = vpop.eup %1539 }
 0x649   :  { %v1542_v45 = vpop.eup %1541  ;;  %1076 = vadd.xlane.f32.xlu1 %v1540_v44 }
 0x64a   :  { %1082 = vadd.xlane.f32.xlu0 %v1542_v45 }
 0x64b   :  { %v1544_v5 = vpop.eup %1543 }
 0x64d   :  { %v1546_v6 = vpop.eup %1545  ;;  %1084 = vadd.xlane.f32.xlu1 %v1544_v5 }
 0x64e   :  { %1086 = vadd.xlane.f32.xlu0 %v1546_v6 }
 0x64f   :  { %v1548_v50 = vpop.eup %1547 }
 0x651   :  { %1088 = vadd.xlane.f32.xlu1 %v1548_v50 }
 0x6be   :  { %v1063_v54 = vpop.xlane.xlu0 %1062 }
 0x6bf   :  { %1549 = vlog2.f32 %v1063_v54 }
 0x6c2   :  { %v1065_v8 = vpop.xlane.xlu1 %1064  ;;  %v1059_v9 = vpop.xlane.xlu0 %1058 }
 0x6c3   :  { %1551 = vlog2.f32 %v1065_v8 }
 0x6c4   :  { %1553 = vlog2.f32 %v1059_v9 }
 0x6c6   :  { %v1061_v10 = vpop.xlane.xlu1 %1060 }
 0x6c7   :  { %1555 = vlog2.f32 %v1061_v10  ;;  %v1071_v12 = vpop.xlane.xlu0 %1070 }
 0x6c8   :  { %1557 = vlog2.f32 %v1071_v12 }
 0x6c9   :  { %v1550_v15 = vpop.eup %1549 }
 0x6ca   :  { %v1095_v16 = vmul.f32 0.6931472, %v1550_v15  ;;  %v1073_v17 = vpop.xlane.xlu1 %1072 }
 0x6cb   :  { %1559 = vlog2.f32 %v1073_v17  ;;  %v1067_v20 = vpop.xlane.xlu0 %1066 }
 0x6cc   :  { %v1124_v22 = vsub.f32 %v1911_v51, %v1095_v16  ;;  %1561 = vlog2.f32 %v1067_v20 }
 0x6cd   :  { %v1552_v23 = vpop.eup %1551 }
 0x6ce   :  { %v1554_v25 = vpop.eup %1553  ;;  %v1140_v26 = vsel %vm961_vm0, %v1124_v22, 0.0  ;;  %v1097_v27 = vmul.f32 0.6931472, %v1552_v23  ;;  %v1069_v29 = vpop.xlane.xlu1 %1068 }
 0x6cf   :  { %1156 = vst [vmem:[%s2069_s8 + $0x10] sm:$0xff] %v1140_v26  ;;  %v1091_v30 = vmul.f32 0.6931472, %v1554_v25  ;;  %1563 = vlog2.f32 %v1069_v29  ;;  %v1079_v31 = vpop.xlane.xlu0 %1078 }
 0x6d0   :  { %v1125_v32 = vsub.f32 %v1917_v11, %v1097_v27  ;;  %1565 = vlog2.f32 %v1079_v31 }
 0x6d1   :  { %v1556_v34 = vpop.eup %1555  ;;  %v1122_v51 = vsub.f32 %v1913_v7, %v1091_v30 }
 0x6d2   :  { %v1558_v35 = vpop.eup %1557  ;;  %v1141_v13 = vsel %vm961_vm0, %v1125_v32, 0.0  ;;  %v1093_v38 = vmul.f32 0.6931472, %v1556_v34  ;;  %v1081_v40 = vpop.xlane.xlu1 %1080 }
 0x6d3   :  { %1157 = vst [vmem:[%s2069_s8 + $0x18] sm:$0xff] %v1141_v13  ;;  %v1138_v42 = vsel %vm961_vm0, %v1122_v51, 0.0  ;;  %v1103_v43 = vmul.f32 0.6931472, %v1558_v35  ;;  %1567 = vlog2.f32 %v1081_v40  ;;  %v1075_v11 = vpop.xlane.xlu0 %1074 }
 0x6d4   :  { %1154 = vst [vmem:[%s2069_s8] sm:$0xff] %v1138_v42  ;;  %v1123_v7 = vsub.f32 %v1919_v14, %v1093_v38  ;;  %1569 = vlog2.f32 %v1075_v11 }
 0x6d5   :  { %v1560_v47 = vpop.eup %1559  ;;  %v1128_v48 = vsub.f32 %v1923_v18, %v1103_v43 }
 0x6d6   :  { %v1562_v49 = vpop.eup %1561  ;;  %v1139_v52 = vsel %vm961_vm0, %v1123_v7, 0.0  ;;  %v1105_v55 = vmul.f32 0.6931472, %v1560_v47  ;;  %v1077_v56 = vpop.xlane.xlu1 %1076 }
 0x6d7   :  { %1155 = vst [vmem:[%s2069_s8 + $0x8] sm:$0xff] %v1139_v52  ;;  %v1144_v57 = vsel %vm961_vm0, %v1128_v48, 0.0  ;;  %v1099_v58 = vmul.f32 0.6931472, %v1562_v49  ;;  %1571 = vlog2.f32 %v1077_v56  ;;  %v1083_v14 = vpop.xlane.xlu0 %1082 }
 0x6d8   :  { %1160 = vst [vmem:[%s2069_s8 + $0x30] sm:$0xff] %v1144_v57  ;;  %v1129_v18 = vsub.f32 %v1925_v21, %v1105_v55  ;;  %1573 = vlog2.f32 %v1083_v14 }
 0x6d9   :  { %v1564_v60 = vpop.eup %1563  ;;  %v1126_v61 = vsub.f32 %v1929_v24, %v1099_v58 }
 0x6da   :  { %v1566_v63 = vpop.eup %1565  ;;  %v1145_v0 = vsel %vm961_vm0, %v1129_v18, 0.0  ;;  %v1101_v1 = vmul.f32 0.6931472, %v1564_v60  ;;  %v1085_v2 = vpop.xlane.xlu1 %1084 }
 0x6db   :  { %1161 = vst [vmem:[%s2069_s8 + $0x38] sm:$0xff] %v1145_v0  ;;  %v1142_v37 = vsel %vm961_vm0, %v1126_v61, 0.0  ;;  %v1111_v4 = vmul.f32 0.6931472, %v1566_v63  ;;  %1575 = vlog2.f32 %v1085_v2  ;;  %v1087_v21 = vpop.xlane.xlu0 %1086 }
 0x6dc   :  { %1158 = vst [vmem:[%s2069_s8 + $0x20] sm:$0xff] %v1142_v37  ;;  %v1127_v24 = vsub.f32 %v1931_v28, %v1101_v1  ;;  %1577 = vlog2.f32 %v1087_v21 }
 0x6dd   :  { %v1568_v39 = vpop.eup %1567  ;;  %v1132_v44 = vsub.f32 %v1935_v33, %v1111_v4 }
 0x6de   :  { %v1570_v45 = vpop.eup %1569  ;;  %v1143_v5 = vsel %vm961_vm0, %v1127_v24, 0.0  ;;  %v1113_v6 = vmul.f32 0.6931472, %v1568_v39  ;;  %v1089_v50 = vpop.xlane.xlu1 %1088 }
 0x6df   :  { %1159 = vst [vmem:[%s2069_s8 + $0x28] sm:$0xff] %v1143_v5  ;;  %v1148_v54 = vsel %vm961_vm0, %v1132_v44, 0.0  ;;  %v1107_v8 = vmul.f32 0.6931472, %v1570_v45  ;;  %1579 = vlog2.f32 %v1089_v50 }
 0x6e0   :  { %1164 = vst [vmem:[%s2069_s8 + $0x50] sm:$0xff] %v1148_v54  ;;  %v1133_v28 = vsub.f32 %v1937_v36, %v1113_v6 }
 0x6e1   :  { %v1572_v33 = vpop.eup %1571  ;;  %v1130_v9 = vsub.f32 %v1942_v41, %v1107_v8 }
 0x6e2   :  { %v1574_v10 = vpop.eup %1573  ;;  %v1149_v12 = vsel %vm961_vm0, %v1133_v28, 0.0  ;;  %v1109_v15 = vmul.f32 0.6931472, %v1572_v33 }
 0x6e3   :  { %1165 = vst [vmem:[%s2069_s8 + $0x58] sm:$0xff] %v1149_v12  ;;  %v1146_v16 = vsel %vm961_vm0, %v1130_v9, 0.0  ;;  %v1115_v17 = vmul.f32 0.6931472, %v1574_v10 }
 0x6e4   :  { %1162 = vst [vmem:[%s2069_s8 + $0x40] sm:$0xff] %v1146_v16  ;;  %v1131_v36 = vsub.f32 %v1945_v46, %v1109_v15 }
 0x6e5   :  { %v1576_v41 = vpop.eup %1575  ;;  %v1134_v20 = vsub.f32 %v1950_v53, %v1115_v17 }
 0x6e6   :  { %v1578_v22 = vpop.eup %1577  ;;  %v1147_v23 = vsel %vm961_vm0, %v1131_v36, 0.0  ;;  %v1117_v25 = vmul.f32 0.6931472, %v1576_v41 }
 0x6e7   :  { %1163 = vst [vmem:[%s2069_s8 + $0x48] sm:$0xff] %v1147_v23  ;;  %v1150_v26 = vsel %vm961_vm0, %v1134_v20, 0.0  ;;  %v1119_v27 = vmul.f32 0.6931472, %v1578_v22 }
 0x6e8   :  { %1166 = vst [vmem:[%s2069_s8 + $0x60] sm:$0xff] %v1150_v26  ;;  %v1135_v46 = vsub.f32 %v1954_v59, %v1117_v25 }
 0x6e9   :  { %v1580_v53 = vpop.eup %1579  ;;  %v1136_v29 = vsub.f32 %v1958_v62, %v1119_v27 }
 0x6ea   :  { %v1151_v30 = vsel %vm961_vm0, %v1135_v46, 0.0  ;;  %v1121_v31 = vmul.f32 0.6931472, %v1580_v53 }
 0x6eb   :  { %1167 = vst [vmem:[%s2069_s8 + $0x68] sm:$0xff] %v1151_v30  ;;  %v1152_v32 = vsel %vm961_vm0, %v1136_v29, 0.0 }
 0x6ec   :  { %1168 = vst [vmem:[%s2069_s8 + $0x70] sm:$0xff] %v1152_v32  ;;  %v1137_v59 = vsub.f32 %v1962_v3, %v1121_v31 }
 0x6ee   :  { %v1153_v62 = vsel %vm961_vm0, %v1137_v59, 0.0 }
 0x6ef   :  { %1169 = vst [vmem:[%s2069_s8 + $0x78] sm:$0xff] %v1153_v62 }
 0x6f0   :  { %1174 = vsyncpa [#allocation3], 1 }

</bundles_post_ra>
